<compile_context>
chip_gen: v7x
topology: tpu7x:2x2x1
jax: 0.10.0
libtpu: 0.0.40
codegen_flags: <defaults>
</compile_context>

<pallas_src>
import functools

import jax
import jax.numpy as jnp
from jax import lax
from jax.experimental import pallas as pl
from jax.experimental.pallas import tpu as pltpu

_NEG_BIG = -1e30  # large negative instead of -inf (avoids inf-inf NaN)


def _round_up(x, m):
    return (x + m - 1) // m * m


def _pad_rows(x, rows):
    if rows == x.shape[0]:
        return x
    return jnp.pad(x, ((0, rows - x.shape[0]), (0, 0)))


def _pad2(x, rows, cols):
    if rows == x.shape[0] and cols == x.shape[1]:
        return x
    return jnp.pad(x, ((0, rows - x.shape[0]), (0, cols - x.shape[1])))


def _pick_tiles(n_anchor_rows, n_contrast_rows, block_b, block_n):
    """Anchor tile tm (multiple of 32: int8 mask packing) and contrast tile tn."""
    tm = _round_up(min(block_b, n_anchor_rows), 32)
    # v7x megacore: keep >= 2 anchor tiles when the batch is big enough so both
    # TensorCores get grid work (irrelevant on single-TC v5e/v6e).
    if n_anchor_rows >= 64 and _round_up(n_anchor_rows, tm) // tm < 2:
        tm = _round_up((n_anchor_rows + 1) // 2, 32)
    tn = _round_up(min(block_n, n_contrast_rows), 128)
    return tm, tn


# ---------------------------------------------------------------------------
# Kernels
# ---------------------------------------------------------------------------
def _supcon_mask_kernel(q_ref, f_ref, mask_ref, selflog_ref, diagcorr_ref,
                        msum_ref, loss_ref, m_sc, s_sc, madc_sc, *,
                        loss_scale, num_real_cols, cols_padded):
    """Supervised-contrastive branch (mask is not None), one (B,N) tile."""
    n = pl.program_id(1)
    n_last = pl.num_programs(1) - 1
    tn = f_ref.shape[0]

    @pl.when(n == 0)
    def _init():
        m_sc[...] = jnp.full_like(m_sc, _NEG_BIG)
        s_sc[...] = jnp.zeros_like(s_sc)
        madc_sc[...] = jnp.zeros_like(madc_sc)

    # anchor . contrast (anchors were pre-scaled by 1/T).  Contract the feature
    # dim of both operands (no transpose of the (tn,C) tile), f32 MXU accum.
    adc = lax.dot_general(
        q_ref[...], f_ref[...],
        dimension_numbers=(((1,), (1,)), ((), ())),
        preferred_element_type=jnp.float32)                          # (tm, tn)

    if cols_padded:
        # Only the artificial column padding needs a per-element mask; the
        # diagonal (self) term is removed algebraically in the finalize step.
        col = lax.broadcasted_iota(jnp.int32, (1, tn), 1) + n * tn
        adc = jnp.where(col < num_real_cols, adc, _NEG_BIG)

    pos = mask_ref[...].astype(jnp.float32)   # padded mask entries are exactly 0

    # Online softmax (the PyTorch max includes the diagonal -> so do we).
    m_old = m_sc[...]
    m_new = jnp.maximum(m_old, jnp.max(adc, axis=1, keepdims=True))
    s_sc[...] = (s_sc[...] * jnp.exp(m_old - m_new)
                 + jnp.sum(jnp.exp(adc - m_new), axis=1, keepdims=True))
    madc_sc[...] += jnp.sum(pos * adc, axis=1, keepdims=True)
    m_sc[...] = m_new

    @pl.when(n == n_last)
    def _fini():
        m = m_sc[...]
        # Remove the self (diagonal) term from the softmax denominator and the
        # positives numerator: same effect as torch.scatter(ones, 1, arange, 0)
        # without any per-element diagonal mask inside the streaming loop.
        s = jnp.maximum(s_sc[...] - jnp.exp(selflog_ref[...] - m), 0.0)
        log_denom = m + jnp.log(s + 1e-12)
        msum = msum_ref[...]
        # msum == 0 (anchor with no positives) -> NaN, exactly like the PyTorch
        # reference; padded anchor rows also hit this but are sliced away
        # before the final mean in the wrapper.
        mean_log_prob_pos = (madc_sc[...] - diagcorr_ref[...]
                             - msum * log_denom) / msum
        loss_ref[...] = loss_scale * mean_log_prob_pos


def _supcon_moco_kernel(q_ref, k_ref, queue_ref, loss_ref,
                        m_sc, s_sc, lpos_sc, *, num_real_cols, cols_padded):
    """MoCo-style branch (mask is None): cross-entropy with label 0."""
    n = pl.program_id(1)
    n_last = pl.num_programs(1) - 1
    tn = queue_ref.shape[0]

    @pl.when(n == 0)
    def _init():
        # l_pos is queue-independent: compute once per anchor tile (q already /T).
        lpos = jnp.sum(q_ref[...].astype(jnp.float32)
                       * k_ref[...].astype(jnp.float32),
                       axis=1, keepdims=True)                        # (tm, 1)
        lpos_sc[...] = lpos
        m_sc[...] = lpos                  # running max starts at the pos logit
        s_sc[...] = jnp.ones_like(s_sc)   # exp(l_pos - l_pos) = 1

    l_neg = lax.dot_general(
        q_ref[...], queue_ref[...],
        dimension_numbers=(((1,), (1,)), ((), ())),
        preferred_element_type=jnp.float32)                          # (tm, tn)

    if cols_padded:
        col = lax.broadcasted_iota(jnp.int32, (1, tn), 1) + n * tn
        l_neg = jnp.where(col < num_real_cols, l_neg, _NEG_BIG)

    m_old = m_sc[...]
    m_new = jnp.maximum(m_old, jnp.max(l_neg, axis=1, keepdims=True))
    s_sc[...] = (s_sc[...] * jnp.exp(m_old - m_new)
                 + jnp.sum(jnp.exp(l_neg - m_new), axis=1, keepdims=True))
    m_sc[...] = m_new

    @pl.when(n == n_last)
    def _fini():
        # -log_softmax(logits)[:, 0] = logsumexp(logits) - l_pos
        loss_ref[...] = m_sc[...] + jnp.log(s_sc[...]) - lpos_sc[...]


# ---------------------------------------------------------------------------
# Wrapper
# ---------------------------------------------------------------------------
def supcon_loss(features, mask=None, batch_size=-1,
                temperature=0.07, base_temperature=0.07, *,
                block_b=256, block_n=1024,
                feature_dtype=jnp.bfloat16, mask_is_binary=True):
    """JAX/Pallas equivalent of SupConLoss.forward."""
    N, C = features.shape
    inv_temp = 1.0 / temperature
    compiler_params = pltpu.CompilerParams(
        dimension_semantics=("parallel", "arbitrary"),
        vmem_limit_bytes=48 * 1024 * 1024)   # fits v5e/v6e (128 MiB) & v7x (64 MiB)

    if mask is not None:
        # Anchors are rows [0, B) of `features` (Python slice semantics; note
        # batch_size=-1 means B = N-1 just like the PyTorch module).
        B = len(range(N)[:batch_size])
        assert mask.shape == (B, N), (mask.shape, (B, N))

        tm, tn = _pick_tiles(B, N, block_b, block_n)
        B_pad = _round_up(B, tm)
        N_pad = _round_up(N, tn)

        # Pre-scale anchors by 1/T BEFORE the streaming-dtype cast (identical
        # relative rounding to casting the raw features) so the kernel never
        # multiplies a (tm,tn) tile by inv_temp.  Slice+scale+cast+pad fuse.
        q_real = (features[:B] * inv_temp).astype(feature_dtype)
        f_real = features.astype(feature_dtype)

        # Per-anchor precomputation ((B,C)-sized, done once in XLA):
        #   self_logit[i] = q_i . f_i        (already / T)
        #   diag_corr[i]  = mask[i,i] * self_logit[i]
        #   msum[i]       = sum_j mask[i,j] - mask[i,i]
        # -> removes the per-tile diagonal masking and one XLU reduction.
        mask_f = mask.astype(jnp.float32)
        self_logit = jnp.sum(q_real.astype(jnp.float32)
                             * f_real[:B].astype(jnp.float32),
                             axis=1, keepdims=True)                  # (B, 1)
        diag = jnp.diagonal(mask_f)[:, None]                          # (B, 1)
        diag_corr = diag * self_logit
        msum = mask_f.sum(axis=1, keepdims=True) - diag               # (B, 1)

        q_p = _pad_rows(q_real, B_pad)
        f_p = _pad_rows(f_real, N_pad)
        # int8 mask stream is exact only for 0/1 masks; pass
        # mask_is_binary=False for soft/weighted masks (streams f32 instead).
        mask_dtype = jnp.int8 if mask_is_binary else jnp.float32
        mask_p = _pad2(mask.astype(mask_dtype), B_pad, N_pad)
        selflog_p = _pad_rows(self_logit, B_pad)
        diagcorr_p = _pad_rows(diag_corr, B_pad)
        msum_p = _pad_rows(msum, B_pad)

        kern = functools.partial(
            _supcon_mask_kernel,
            loss_scale=-(temperature / base_temperature),
            num_real_cols=N, cols_padded=(N_pad != N))

        out = pl.pallas_call(
            kern,
            out_shape=jax.ShapeDtypeStruct((B_pad, 1), jnp.float32),
            grid_spec=pltpu.PrefetchScalarGridSpec(
                num_scalar_prefetch=0,
                grid=(B_pad // tm, N_pad // tn),
                in_specs=[
                    pl.BlockSpec((tm, C), lambda i, n: (i, 0)),     # anchors / T
                    pl.BlockSpec((tn, C), lambda i, n: (n, 0)),     # contrast tile
                    pl.BlockSpec((tm, tn), lambda i, n: (i, n)),    # positives mask
                    pl.BlockSpec((tm, 1), lambda i, n: (i, 0)),     # self logit
                    pl.BlockSpec((tm, 1), lambda i, n: (i, 0)),     # diag correction
                    pl.BlockSpec((tm, 1), lambda i, n: (i, 0)),     # msum
                ],
                out_specs=pl.BlockSpec((tm, 1), lambda i, n: (i, 0)),
                scratch_shapes=[pltpu.VMEM((tm, 1), jnp.float32)] * 3),
            compiler_params=compiler_params,
        )(q_p, f_p, mask_p, selflog_p, diagcorr_p, msum_p)
        return jnp.mean(out[:B, 0])

    else:
        # MoCo-style split (degenerate for batch_size <= 0, like the module).
        q = features[:batch_size]
        k = features[batch_size:batch_size * 2]
        queue = features[batch_size * 2:]
        B = q.shape[0]
        K = queue.shape[0]

        tm, tn = _pick_tiles(B, K, block_b, block_n)
        B_pad = _round_up(B, tm)
        K_pad = _round_up(K, tn)

        # Slice + 1/T scale + dtype cast + pad fuse into one XLA pass per
        # operand, so there is no extra HBM round-trip beyond the bf16 cast.
        q_p = _pad_rows((q * inv_temp).astype(feature_dtype), B_pad)
        k_p = _pad_rows(k.astype(feature_dtype), B_pad)
        queue_p = _pad_rows(queue.astype(feature_dtype), K_pad)

        kern = functools.partial(_supcon_moco_kernel,
                                 num_real_cols=K, cols_padded=(K_pad != K))

        out = pl.pallas_call(
            kern,
            out_shape=jax.ShapeDtypeStruct((B_pad, 1), jnp.float32),
            grid_spec=pltpu.PrefetchScalarGridSpec(
                num_scalar_prefetch=0,
                grid=(B_pad // tm, K_pad // tn),
                in_specs=[
                    pl.BlockSpec((tm, C), lambda i, n: (i, 0)),     # q / T
                    pl.BlockSpec((tm, C), lambda i, n: (i, 0)),     # k
                    pl.BlockSpec((tn, C), lambda i, n: (n, 0)),     # queue tile
                ],
                out_specs=pl.BlockSpec((tm, 1), lambda i, n: (i, 0)),
                scratch_shapes=[pltpu.VMEM((tm, 1), jnp.float32)] * 3),
            compiler_params=compiler_params,
        )(q_p, k_p, queue_p)
        return jnp.mean(out[:B, 0])


# ---------------------------------------------------------------------------
# Pure-JAX references (sanity checks only).  They take anchors that ALREADY
# include the 1/temperature scale so the exact same (possibly bf16-rounded)
# operands the kernel streams can be fed in.
# ---------------------------------------------------------------------------
def _ref_mask(q_scaled, contrast, mask, temperature, base_temperature):
    mask = mask.astype(jnp.float32)
    B = q_scaled.shape[0]
    N = contrast.shape[0]
    adc = jnp.matmul(q_scaled, contrast.T)            # already includes 1/T
    logits = adc - jnp.max(adc, axis=1, keepdims=True)
    logits_mask = jnp.ones((B, N), jnp.float32).at[
        jnp.arange(B), jnp.arange(B)].set(0.0)
    mask = mask * logits_mask
    exp_logits = jnp.exp(logits) * logits_mask
    log_prob = logits - jnp.log(exp_logits.sum(1, keepdims=True) + 1e-12)
    mean_log_prob_pos = (mask * log_prob).sum(1) / mask.sum(1)
    return (-(temperature / base_temperature) * mean_log_prob_pos).mean()


def _ref_moco(q_scaled, k, queue):
    l_pos = jnp.sum(q_scaled * k, axis=1, keepdims=True)
    l_neg = jnp.matmul(q_scaled, queue.T)
    logits = jnp.concatenate([l_pos, l_neg], axis=1)   # already includes 1/T
    return jnp.mean(jax.nn.logsumexp(logits, axis=1) - logits[:, 0])


# ---------------------------------------------------------------------------
if __name__ == "__main__":
    key = jax.random.PRNGKey(0)
    B, C, K = 8, 32, 300
    N = 2 * B + K                      # 316 samples: q | k | queue

    features = jax.random.normal(key, (N, C), dtype=jnp.float32)
    features = features / jnp.linalg.norm(features, axis=1, keepdims=True)

    labels = jnp.arange(N, dtype=jnp.int32) % 4
    mask = (labels[:B, None] == labels[None, :]).astype(jnp.float32)

    T = 0.07
    inv_T = 1.0 / T

    def rt_bf16(x):  # bf16 round-trip matching the kernel's streaming dtype
        return x.astype(jnp.bfloat16).astype(jnp.float32)

    # block_n=128 -> 3 contrast/queue tiles (incl. a padded one): exercises the
    # online-softmax accumulation; defaults cover the single-tile path;
    # feature_dtype=float32 checks the exact-math path.
    loss_mask_mt = supcon_loss(features, mask=mask, batch_size=B, block_n=128)
    loss_mask_1t = supcon_loss(features, mask=mask, batch_size=B)
    loss_mask_f32 = supcon_loss(features, mask=mask, batch_size=B,
                                feature_dtype=jnp.float32, block_n=128)
    loss_moco_mt = supcon_loss(features, mask=None, batch_size=B, block_n=128)
    loss_moco_1t = supcon_loss(features, mask=None, batch_size=B)
    loss_moco_f32 = supcon_loss(features, mask=None, batch_size=B,
                                feature_dtype=jnp.float32, block_n=128)
    jax.block_until_ready((loss_mask_mt, loss_mask_1t, loss_mask_f32,
                           loss_moco_mt, loss_moco_1t, loss_moco_f32))

    # bf16-streaming kernels vs a reference built from the same bf16-rounded
    # operands (tight check of the kernel math itself).
    ref_mask_bf16 = _ref_mask(rt_bf16(features[:B] * inv_T), rt_bf16(features),
                              mask, T, T)
    ref_moco_bf16 = _ref_moco(rt_bf16(features[:B] * inv_T),
                              rt_bf16(features[B:2 * B]),
                              rt_bf16(features[2 * B:]))
    # f32-streaming kernels vs the full-precision reference.
    ref_mask_f32 = _ref_mask(features[:B] * inv_T, features, mask, T, T)
    ref_moco_f32 = _ref_moco(features[:B] * inv_T, features[B:2 * B],
                             features[2 * B:])

    checks = [
        ("mask/bf16/multi-tile", loss_mask_mt, ref_mask_bf16),
        ("mask/bf16/1-tile", loss_mask_1t, ref_mask_bf16),
        ("mask/f32", loss_mask_f32, ref_mask_f32),
        ("moco/bf16/multi-tile", loss_moco_mt, ref_moco_bf16),
        ("moco/bf16/1-tile", loss_moco_1t, ref_moco_bf16),
        ("moco/f32", loss_moco_f32, ref_moco_f32),
    ]
    for name, got, want in checks:
        assert jnp.allclose(got, want, rtol=2e-3, atol=2e-3), (name, got, want)

    print("KERNEL_OK")
</pallas_src>

<mosaic_0001>
module attributes {stable_mosaic.version = 11 : i64} {
  func.func @_supcon_mask_kernel(%arg0: i32, %arg1: i32, %arg2: memref<32x32xbf16, #tpu.memory_space<vmem>>, %arg3: memref<128x32xbf16, #tpu.memory_space<vmem>>, %arg4: memref<32x128xi8, #tpu.memory_space<vmem>>, %arg5: memref<32x1xf32, #tpu.memory_space<vmem>>, %arg6: memref<32x1xf32, #tpu.memory_space<vmem>>, %arg7: memref<32x1xf32, #tpu.memory_space<vmem>>, %arg8: memref<32x1xf32, #tpu.memory_space<vmem>>, %arg9: memref<32x1xf32, #tpu.memory_space<vmem>>, %arg10: memref<32x1xf32, #tpu.memory_space<vmem>>, %arg11: memref<32x1xf32, #tpu.memory_space<vmem>>) attributes {dimension_semantics = [#tpu.dimension_semantics<parallel>, #tpu.dimension_semantics<arbitrary>], iteration_bounds = array<i64: 1, 3>, scalar_prefetch = 0 : i64, scratch_operands = 3 : i64, tpu.core_type = #tpu.core_type<tc>, window_params = [{transform_indices = @transform_0, window_bounds = array<i64: 32, 32>}, {transform_indices = @transform_1, window_bounds = array<i64: 128, 32>}, {transform_indices = @transform_2, window_bounds = array<i64: 32, 128>}, {transform_indices = @transform_3, window_bounds = array<i64: 32, 1>}, {transform_indices = @transform_4, window_bounds = array<i64: 32, 1>}, {transform_indices = @transform_5, window_bounds = array<i64: 32, 1>}, {transform_indices = @transform_6, window_bounds = array<i64: 32, 1>}]} {
    %c0_i32 = arith.constant 0 : i32
    %0 = arith.cmpi eq, %arg1, %c0_i32 : i32
    %1 = arith.extui %0 : i1 to i32
    %c0_i32_0 = arith.constant 0 : i32
    %2 = arith.cmpi ne, %1, %c0_i32_0 : i32
    scf.if %2 {
      %cst_23 = arith.constant -1.000000e+30 : f32
      %43 = vector.broadcast %cst_23 : f32 to vector<32x1xf32>
      %c0_24 = arith.constant 0 : index
      %c0_25 = arith.constant 0 : index
      %44 = vector.load %arg9[%c0_24, %c0_25] : memref<32x1xf32, #tpu.memory_space<vmem>>, vector<32x1xf32>
      tpu.vector_store %arg9[%c0_24, %c0_25], %43 {strides = array<i32>} : memref<32x1xf32, #tpu.memory_space<vmem>>, vector<32x1xf32>,
      %cst_26 = arith.constant 0.000000e+00 : f32
      %45 = vector.broadcast %cst_26 : f32 to vector<32x1xf32>
      %c0_27 = arith.constant 0 : index
      %c0_28 = arith.constant 0 : index
      %46 = vector.load %arg10[%c0_27, %c0_28] : memref<32x1xf32, #tpu.memory_space<vmem>>, vector<32x1xf32>
      tpu.vector_store %arg10[%c0_27, %c0_28], %45 {strides = array<i32>} : memref<32x1xf32, #tpu.memory_space<vmem>>, vector<32x1xf32>,
      %cst_29 = arith.constant 0.000000e+00 : f32
      %47 = vector.broadcast %cst_29 : f32 to vector<32x1xf32>
      %c0_30 = arith.constant 0 : index
      %c0_31 = arith.constant 0 : index
      %48 = vector.load %arg11[%c0_30, %c0_31] : memref<32x1xf32, #tpu.memory_space<vmem>>, vector<32x1xf32>
      tpu.vector_store %arg11[%c0_30, %c0_31], %47 {strides = array<i32>} : memref<32x1xf32, #tpu.memory_space<vmem>>, vector<32x1xf32>,
    } else {
    }
    %c0 = arith.constant 0 : index
    %c0_1 = arith.constant 0 : index
    %3 = vector.load %arg2[%c0, %c0_1] : memref<32x32xbf16, #tpu.memory_space<vmem>>, vector<32x32xbf16>
    %c0_2 = arith.constant 0 : index
    %c0_3 = arith.constant 0 : index
    %4 = vector.load %arg3[%c0_2, %c0_3] : memref<128x32xbf16, #tpu.memory_space<vmem>>, vector<128x32xbf16>
    %cst = arith.constant dense<0.000000e+00> : vector<32x128xf32>
    %5 = tpu.matmul %3, %4, %cst {dimension_numbers = #tpu.dot_dimension_numbers<[1], [1], [0], [0], [0, 0, 1, 0], [], []>} : vector<32x32xbf16>, vector<128x32xbf16>, vector<32x128xf32> -> vector<32x128xf32>
    %6 = tpu.iota {dimensions = array<i32: 1>} : vector<1x128xi32>
    %c128_i32 = arith.constant 128 : i32
    %7 = arith.muli %arg1, %c128_i32 : i32
    %8 = vector.broadcast %7 : i32 to vector<1x128xi32>
    %9 = arith.addi %6, %8 : vector<1x128xi32>
    %c316_i32 = arith.constant 316 : i32
    %10 = vector.broadcast %c316_i32 : i32 to vector<1x128xi32>
    %11 = arith.cmpi slt, %9, %10 : vector<1x128xi32>
    %cst_4 = arith.constant -1.000000e+30 : f32
    %12 = vector.shape_cast %11 : vector<1x128xi1> to vector<1x128xi1>
    %13 = vector.broadcast %12 : vector<1x128xi1> to vector<32x128xi1>
    %14 = vector.broadcast %cst_4 : f32 to vector<32x128xf32>
    %15 = arith.select %13, %5, %14 : vector<32x128xi1>, vector<32x128xf32>
    %c0_5 = arith.constant 0 : index
    %c0_6 = arith.constant 0 : index
    %16 = vector.load %arg4[%c0_5, %c0_6] : memref<32x128xi8, #tpu.memory_space<vmem>>, vector<32x128xi8>
    %17 = arith.sitofp %16 : vector<32x128xi8> to vector<32x128xf32>
    %c0_7 = arith.constant 0 : index
    %c0_8 = arith.constant 0 : index
    %18 = vector.load %arg9[%c0_7, %c0_8] : memref<32x1xf32, #tpu.memory_space<vmem>>, vector<32x1xf32>
    %cst_9 = arith.constant dense<0xFF800000> : vector<32xf32>
    %19 = vector.multi_reduction <maximumf>, %15, %cst_9 [1] : vector<32x128xf32> to vector<32xf32>
    %20 = vector.shape_cast %19 : vector<32xf32> to vector<32x1xf32>
    %21 = arith.maximumf %18, %20 : vector<32x1xf32>
    %c0_10 = arith.constant 0 : index
    %c0_11 = arith.constant 0 : index
    %22 = vector.load %arg10[%c0_10, %c0_11] : memref<32x1xf32, #tpu.memory_space<vmem>>, vector<32x1xf32>
    %23 = arith.subf %18, %21 : vector<32x1xf32>
    %24 = math.exp %23 : vector<32x1xf32>
    %25 = arith.mulf %22, %24 : vector<32x1xf32>
    %26 = vector.broadcast %21 : vector<32x1xf32> to vector<32x128xf32>
    %27 = arith.subf %15, %26 : vector<32x128xf32>
    %28 = math.exp %27 : vector<32x128xf32>
    %cst_12 = arith.constant dense<0.000000e+00> : vector<32xf32>
    %29 = vector.multi_reduction <add>, %28, %cst_12 [1] : vector<32x128xf32> to vector<32xf32>
    %30 = vector.shape_cast %29 : vector<32xf32> to vector<32x1xf32>
    %31 = arith.addf %25, %30 : vector<32x1xf32>
    %c0_13 = arith.constant 0 : index
    %c0_14 = arith.constant 0 : index
    %32 = vector.load %arg10[%c0_13, %c0_14] : memref<32x1xf32, #tpu.memory_space<vmem>>, vector<32x1xf32>
    tpu.vector_store %arg10[%c0_13, %c0_14], %31 {strides = array<i32>} : memref<32x1xf32, #tpu.memory_space<vmem>>, vector<32x1xf32>,
    %c0_15 = arith.constant 0 : index
    %c0_16 = arith.constant 0 : index
    %33 = vector.load %arg11[%c0_15, %c0_16] : memref<32x1xf32, #tpu.memory_space<vmem>>, vector<32x1xf32>
    %34 = arith.mulf %17, %15 : vector<32x128xf32>
    %cst_17 = arith.constant dense<0.000000e+00> : vector<32xf32>
    %35 = vector.multi_reduction <add>, %34, %cst_17 [1] : vector<32x128xf32> to vector<32xf32>
    %36 = vector.shape_cast %35 : vector<32xf32> to vector<32x1xf32>
    %37 = arith.addf %33, %36 : vector<32x1xf32>
    %c0_18 = arith.constant 0 : index
    %c0_19 = arith.constant 0 : index
    %38 = vector.load %arg11[%c0_18, %c0_19] : memref<32x1xf32, #tpu.memory_space<vmem>>, vector<32x1xf32>
    tpu.vector_store %arg11[%c0_18, %c0_19], %37 {strides = array<i32>} : memref<32x1xf32, #tpu.memory_space<vmem>>, vector<32x1xf32>,
    %c0_20 = arith.constant 0 : index
    %c0_21 = arith.constant 0 : index
    %39 = vector.load %arg9[%c0_20, %c0_21] : memref<32x1xf32, #tpu.memory_space<vmem>>, vector<32x1xf32>
    tpu.vector_store %arg9[%c0_20, %c0_21], %21 {strides = array<i32>} : memref<32x1xf32, #tpu.memory_space<vmem>>, vector<32x1xf32>,
    %c2_i32 = arith.constant 2 : i32
    %40 = arith.cmpi eq, %arg1, %c2_i32 : i32
    %41 = arith.extui %40 : i1 to i32
    %c0_i32_22 = arith.constant 0 : i32
    %42 = arith.cmpi ne, %41, %c0_i32_22 : i32
    scf.if %42 {
      %c0_23 = arith.constant 0 : index
      %c0_24 = arith.constant 0 : index
      %43 = vector.load %arg9[%c0_23, %c0_24] : memref<32x1xf32, #tpu.memory_space<vmem>>, vector<32x1xf32>
      %c0_25 = arith.constant 0 : index
      %c0_26 = arith.constant 0 : index
      %44 = vector.load %arg10[%c0_25, %c0_26] : memref<32x1xf32, #tpu.memory_space<vmem>>, vector<32x1xf32>
      %c0_27 = arith.constant 0 : index
      %c0_28 = arith.constant 0 : index
      %45 = vector.load %arg5[%c0_27, %c0_28] : memref<32x1xf32, #tpu.memory_space<vmem>>, vector<32x1xf32>
      %46 = arith.subf %45, %43 : vector<32x1xf32>
      %47 = math.exp %46 : vector<32x1xf32>
      %48 = arith.subf %44, %47 : vector<32x1xf32>
      %cst_29 = arith.constant 0.000000e+00 : f32
      %49 = vector.broadcast %cst_29 : f32 to vector<32x1xf32>
      %50 = arith.maximumf %48, %49 : vector<32x1xf32>
      %cst_30 = arith.constant 9.99999996E-13 : f32
      %51 = vector.broadcast %cst_30 : f32 to vector<32x1xf32>
      %52 = arith.addf %50, %51 : vector<32x1xf32>
      %53 = math.log %52 : vector<32x1xf32>
      %54 = arith.addf %43, %53 : vector<32x1xf32>
      %c0_31 = arith.constant 0 : index
      %c0_32 = arith.constant 0 : index
      %55 = vector.load %arg7[%c0_31, %c0_32] : memref<32x1xf32, #tpu.memory_space<vmem>>, vector<32x1xf32>
      %c0_33 = arith.constant 0 : index
      %c0_34 = arith.constant 0 : index
      %56 = vector.load %arg11[%c0_33, %c0_34] : memref<32x1xf32, #tpu.memory_space<vmem>>, vector<32x1xf32>
      %c0_35 = arith.constant 0 : index
      %c0_36 = arith.constant 0 : index
      %57 = vector.load %arg6[%c0_35, %c0_36] : memref<32x1xf32, #tpu.memory_space<vmem>>, vector<32x1xf32>
      %58 = arith.subf %56, %57 : vector<32x1xf32>
      %59 = arith.mulf %55, %54 : vector<32x1xf32>
      %60 = arith.subf %58, %59 : vector<32x1xf32>
      %61 = arith.divf %60, %55 : vector<32x1xf32>
      %cst_37 = arith.constant -1.000000e+00 : f32
      %62 = vector.broadcast %cst_37 : f32 to vector<32x1xf32>
      %63 = arith.mulf %62, %61 : vector<32x1xf32>
      %c0_38 = arith.constant 0 : index
      %c0_39 = arith.constant 0 : index
      %64 = vector.load %arg8[%c0_38, %c0_39] : memref<32x1xf32, #tpu.memory_space<vmem>>, vector<32x1xf32>
      tpu.vector_store %arg8[%c0_38, %c0_39], %63 {strides = array<i32>} : memref<32x1xf32, #tpu.memory_space<vmem>>, vector<32x1xf32>,
    } else {
    }
    return
  }
  func.func @transform_0(%arg0: i32, %arg1: i32) -> (i32, i32) {
    %c0_i32 = arith.constant 0 : i32
    %c0_i32_0 = arith.constant 0 : i32
    return %arg0, %c0_i32 : i32, i32
  }
  func.func @transform_1(%arg0: i32, %arg1: i32) -> (i32, i32) {
    %c0_i32 = arith.constant 0 : i32
    %c0_i32_0 = arith.constant 0 : i32
    return %arg1, %c0_i32 : i32, i32
  }
  func.func @transform_2(%arg0: i32, %arg1: i32) -> (i32, i32) {
    %c0_i32 = arith.constant 0 : i32
    return %arg0, %arg1 : i32, i32
  }
  func.func @transform_3(%arg0: i32, %arg1: i32) -> (i32, i32) {
    %c0_i32 = arith.constant 0 : i32
    %c0_i32_0 = arith.constant 0 : i32
    return %arg0, %c0_i32 : i32, i32
  }
  func.func @transform_4(%arg0: i32, %arg1: i32) -> (i32, i32) {
    %c0_i32 = arith.constant 0 : i32
    %c0_i32_0 = arith.constant 0 : i32
    return %arg0, %c0_i32 : i32, i32
  }
  func.func @transform_5(%arg0: i32, %arg1: i32) -> (i32, i32) {
    %c0_i32 = arith.constant 0 : i32
    %c0_i32_0 = arith.constant 0 : i32
    return %arg0, %c0_i32 : i32, i32
  }
  func.func @transform_6(%arg0: i32, %arg1: i32) -> (i32, i32) {
    %c0_i32 = arith.constant 0 : i32
    %c0_i32_0 = arith.constant 0 : i32
    return %arg0, %c0_i32 : i32, i32
  }
}

</mosaic_0001>

<bundles_post_ra>
// kernel: tpu_custom_call.1
= control target key start
LH: loop header
LB: loop body
LE: loop exit
PB: predicated region body
PF: predicated region fallthrough
CT: control target
= control target key end

     0   :  { %s1129_s21 = smov 0   ;;  %s1131_s22 = smov 0   ;;  %s1330_s0 = inlined_call_operand.vmem [shape: bf16[32,32], index: 0, kind: input, shape index: {}]   ;;  %s1331_s1 = inlined_call_operand.vmem [shape: bf16[384,32], index: 1, kind: input, shape index: {}]   ;;  %s1332_s2 = inlined_call_operand.vmem [shape: s8[32,384], index: 2, kind: input, shape index: {}]   ;;  %s1333_s3 = inlined_call_operand.vmem [shape: f32[32,1], index: 3, kind: input, shape index: {}]   ;;  %s1334_s4 = inlined_call_operand.vmem [shape: f32[32,1], index: 4, kind: input, shape index: {}]   ;;  %s1335_s5 = inlined_call_operand.vmem [shape: f32[32,1], index: 5, kind: input, shape index: {}]   ;;  %s1336_s6 = inlined_call_operand.vmem [shape: f32[32,1], index: 6, kind: output, shape index: {}]  }
   0x1   :  { %s1133_s23 = smov 0  }
   0x2 LB: > { %s25_s24 = sadd.s32 1, %s1085_s22  ;;  %p927_p0 = scmp.ge.s32.totalorder %s1089_s23, 1  ;;  %s1089_s23 = sphi %s1133_s23, %s16_s23   ;;  %s1085_s22 = sphi %s1131_s22, %s1338_s22   ;;  %s1081_s21 = sphi %s1129_s21, %s1337_s21  }
   0x3   : > { %p26_p1 = scmp.ge.s32.totalorder %s25_s24, 3  ;;  %p284_p2 = scmp.lt.s32.totalorder %s1089_s23, 4 }
   0x5   : > { %s1340_s24 = smov (%p26_p1, %s25_s24), 0  ;;  %p285_p3 = pnand %p927_p0, %p284_p2 }
   0x6   : > { %s928_s25 = sshll.u32 (!%p285_p3), %s1081_s21, 4  ;;  %p356_p4 = scmp.lt.s32.totalorder (!%p285_p3), %s1081_s21, 2 }
   0x7   : > { %288 = sbr.rel (%p285_p3) target bundleno = 779 (0x30b), region = 44  ;;  %p349_p5 = scmp.lt.s32.totalorder (!%p285_p3), %s928_s25, 47 }
   0x8   : > { %p931_p6 = scmp.ne.s32.totalorder (!%p285_p3), %s1081_s21, 0 }
   0xe   : > { %s357_s26 = scalar_select %p356_p4, %s1081_s21, 2 }
   0xf   : > { %s1342_s25 = smov (!%p349_p5, %s928_s25), 47  ;;  %390 = sbr.rel (%p931_p6) target bundleno = 23 (0x17), region = 48 }
  0x10   : > { %s930_s27 = sshll.u32 %s357_s26, 3  ;;  %s929_s28 = sshll.u32 %s1342_s25, 2  ;;  %vm391_vm0 = vcmask (!%p931_p6), 7168   ;;  %v1091_v0 = vmov (!%p931_p6), -1e+30   ;;  %v1092_v1 = vmov (!%p931_p6), 0.0  }
  0x11   : > { %s1155_s7 = scalar_lea.vmem %s1332_s2, %s930_s27  ;;  %s1160_s10 = scalar_lea.vmem %s1331_s1, %s929_s28  ;;  %392 = vst.msk [vmem:[#allocation2] sm:$0xff] (!%p931_p6), %vm391_vm0, %v1091_v0  ;;  %393 = vst.msk [vmem:[#allocation2 + $0x8] sm:$0xff] (!%p931_p6), %vm391_vm0, %v1091_v0 }
  0x12   : > { %394 = vst.msk [vmem:[#allocation2 + $0x10] sm:$0xff] (!%p931_p6), %vm391_vm0, %v1091_v0  ;;  %395 = vst.msk [vmem:[#allocation2 + $0x18] sm:$0xff] (!%p931_p6), %vm391_vm0, %v1091_v0 }
  0x13   : > { %396 = vst.msk [vmem:[#allocation3] sm:$0xff] (!%p931_p6), %vm391_vm0, %v1092_v1  ;;  %397 = vst.msk [vmem:[#allocation3 + $0x8] sm:$0xff] (!%p931_p6), %vm391_vm0, %v1092_v1 }
  0x14   : > { %398 = vst.msk [vmem:[#allocation3 + $0x10] sm:$0xff] (!%p931_p6), %vm391_vm0, %v1092_v1  ;;  %399 = vst.msk [vmem:[#allocation3 + $0x18] sm:$0xff] (!%p931_p6), %vm391_vm0, %v1092_v1 }
  0x15   : > { %400 = vst.msk [vmem:[#allocation4] sm:$0xff] (!%p931_p6), %vm391_vm0, %v1092_v1  ;;  %401 = vst.msk [vmem:[#allocation4 + $0x8] sm:$0xff] (!%p931_p6), %vm391_vm0, %v1092_v1 }
  0x16   : > { %402 = vst.msk [vmem:[#allocation4 + $0x10] sm:$0xff] %vm391_vm0, %v1092_v1  ;;  %403 = vst.msk [vmem:[#allocation4 + $0x18] sm:$0xff] %vm391_vm0, %v1092_v1 }
  0x17 PF: > { %v1017_v2 = vld [vmem:[%s1160_s10] sm:$0xff]   ;;  %vm474_vm1 = vcmask 261120   ;;  %v1018_v3 = vld [vmem:[%s1160_s10 + $0x8] sm:$0xff]   ;;  %v1019_v5 = vld [vmem:[%s1160_s10 + $0x10] sm:$0xff]   ;;  %v554_v20 = vlaneseq  ;;  %s944_s15 = sshll.u32 %s1081_s21, 7  ;;  %v1093_v32 = vmov 0  }
  0x18   : > { %980 = vmatprep.subr.msk.bf16.mxu0 %vm474_vm1, %v1017_v2  ;;  %v482_v4 = vsel %vm474_vm1, %v1017_v2, 0  ;;  %v485_v6 = vsel %vm474_vm1, %v1018_v3, 0  ;;  %v1025_v7 = vld [vmem:[%s1330_s0] sm:$0xff]   ;;  %v488_v8 = vsel %vm474_vm1, %v1019_v5, 0  ;;  %v1020_v9 = vld [vmem:[%s1160_s10 + $0x18] sm:$0xff]   ;;  %v1022_v13 = vld [vmem:[%s1160_s10 + $0x28] sm:$0xff]   ;;  %v557_v22 = vstv %s944_s15  ;;  %1016 = vset.pattern.permute.xlu1 %v1093_v32 }
  0x19   : > { %961 = vmatpush3.bf16.xpose.msra.mxu0 %v482_v4  ;;  %976 = vmatprep.mubr.msk.bf16.mxu0 %vm474_vm1, %v1025_v7  ;;  %v491_v10 = vsel %vm474_vm1, %v1020_v9, 0  ;;  %v1021_v11 = vld [vmem:[%s1160_s10 + $0x20] sm:$0xff]   ;;  %v497_v14 = vsel %vm474_vm1, %v1022_v13, 0  ;;  %v1023_v15 = vld [vmem:[%s1160_s10 + $0x30] sm:$0xff]   ;;  %v1024_v17 = vld [vmem:[%s1160_s10 + $0x38] sm:$0xff]   ;;  %v555_v21 = vand.u32 127, %v554_v20 }
  0x1a   : > { %981 = vmatprep.subr.msk.bf16.mxu0 %vm474_vm1, %v1018_v3  ;;  %v494_v12 = vsel %vm474_vm1, %v1021_v11, 0  ;;  %v500_v16 = vsel %vm474_vm1, %v1023_v15, 0  ;;  %v503_v18 = vsel %vm474_vm1, %v1024_v17, 0  ;;  %v1026_v19 = vld [vmem:[%s1330_s0 + $0x8] sm:$0xff]   ;;  %1015 = vset.pattern.permute.xlu0 %v1093_v32  ;;  %v1202_v33 = vld [vmem:[#allocation2 + $0x10] sm:$0xff]  ;;  %v1204_v34 = vld [vmem:[#allocation2] sm:$0xff] }
  0x1b   : > { %v558_v23 = vadd.s32 %v557_v22, %v555_v21  ;;  %vm655_vm3 = vcmask 7168   ;;  %v1212_v39 = vld [vmem:[#allocation2 + $0x18] sm:$0xff]  ;;  %v1219_v41 = vld [vmem:[#allocation2 + $0x8] sm:$0xff]  ;;  %v566_v49 = vld [vmem:[%s1155_s7] sm:$0xff]  ;;  %p945_p7 = scmp.ne.s32.totalorder %s1081_s21, 2 }
  0x1c   : > { %v567_v50 = vunpack.c.0.s8 %v566_v49  ;;  %v568_v52 = vunpack.c.1.s8 %v566_v49  ;;  %v592_v32 = vld [vmem:[#allocation3 + $0x8] sm:$0xff] }
  0x1d   : > { %vm559_vm2 = vcmp.lt.s32.totalorder %v558_v23, 316 }
  0x1e   : > { %v571_v51 = vcvt.s32.f32 %v567_v50  ;;  %v572_v54 = vcvt.s32.f32 %v568_v52 }
  0x21   : > { %963 = vmatpush3.bf16.xpose.msra.mxu0 %v485_v6 }
  0x22   : > { %982 = vmatprep.subr.msk.bf16.mxu0 %vm474_vm1, %v1019_v5  ;;  %v569_v5 = vunpack.c.2.s8 %v566_v49 }
  0x24   : > { %v573_v7 = vcvt.s32.f32 %v569_v5 }
  0x29   : > { %965 = vmatpush3.bf16.xpose.msra.mxu0 %v488_v8  ;;  %v570_v8 = vunpack.c.3.s8 %v566_v49 }
  0x2a   : > { %983 = vmatprep.subr.msk.bf16.mxu0 %vm474_vm1, %v1020_v9 }
  0x31   : > { %967 = vmatpush3.bf16.xpose.msra.mxu0 %v491_v10 }
  0x32   : > { %984 = vmatprep.subr.msk.bf16.mxu0 %vm474_vm1, %v1021_v11  ;;  %v574_v11 = vcvt.s32.f32 %v570_v8 }
  0x39   : > { %969 = vmatpush3.bf16.xpose.msra.mxu0 %v494_v12 }
  0x3a   : > { %985 = vmatprep.subr.msk.bf16.mxu0 %vm474_vm1, %v1022_v13 }
  0x41   : > { %971 = vmatpush3.bf16.xpose.msra.mxu0 %v497_v14  ;;  %v660_v14 = vld [vmem:[#allocation4] sm:$0xff] }
  0x42   : > { %986 = vmatprep.subr.msk.bf16.mxu0 %vm474_vm1, %v1023_v15 }
  0x49   : > { %973 = vmatpush3.bf16.xpose.msra.mxu0 %v500_v16 }
  0x4a   : > { %987 = vmatprep.subr.msk.bf16.mxu0 %vm474_vm1, %v1024_v17  ;;  %v661_v17 = vld [vmem:[#allocation4 + $0x8] sm:$0xff] }
  0x51   : > { %975 = vmatpush3.bf16.xpose.msra.mxu0 %v503_v18 }
  0x58   : > { %977 = vmatmul.mubr.msk.bf16.vlgmr.msra.gmra.mrb[0].mxu0 %vm474_vm1, %v1026_v19 }
 0x12b   : > { %v978_v24 = vpop.f32.mrb[0].mxu0 }
 0x12c   : > { %v1196_v25 = vsel %vm559_vm2, %v978_v24, -1e+30  ;;  %v539_v26 = vpop.f32.mrb[1].mxu0 }
 0x12d   : > { %v562_v27 = vsel %vm559_vm2, %v539_v26, -1e+30  ;;  %583 = vmax.xlane.f32.xlu1 %v1196_v25  ;;  %v979_v28 = vpop.f32.mrb[2].mxu0  ;;  %v666_v10 = vmul.f32 %v573_v7, %v1196_v25 }
 0x12e   : > { %579 = vmax.xlane.f32.xlu0 %v562_v27  ;;  %v542_v29 = vpop.f32.mrb[3].mxu0  ;;  %v1199_v30 = vsel %vm559_vm2, %v979_v28, -1e+30  ;;  %v664_v53 = vmul.f32 %v571_v51, %v562_v27  ;;  %v700_v51 = vld [vmem:[%s1333_s3] sm:$0xff] (!%p945_p7) }
 0x12f   : > { %v563_v31 = vsel %vm559_vm2, %v542_v29, -1e+30  ;;  %v667_v13 = vmul.f32 %v574_v11, %v1199_v30  ;;  %v591_v29 = vld [vmem:[#allocation3] sm:$0xff] }
 0x130   : > { %v665_v55 = vmul.f32 %v572_v54, %v563_v31  ;;  %v701_v54 = vld [vmem:[%s1333_s3 + $0x8] sm:$0xff] (!%p945_p7) }
 0x131   : > { %585 = vmax.xlane.f32.xlu1 %v1199_v30 }
 0x132   : > { %581 = vmax.xlane.f32.xlu0 %v563_v31 }
 0x1ba   : > { %v584_v35 = vpop.xlane.xlu1 %583 }
 0x1bb   : > { %v1207_v36 = vmax.f32 %v1202_v33, %v584_v35  ;;  %v580_v37 = vpop.xlane.xlu0 %579 }
 0x1bc   : > { %v1210_v38 = vmax.f32 %v1204_v34, %v580_v37 }
 0x1bd   : > { %v597_v40 = vsub.f32 %v1202_v33, %v1207_v36  ;;  %686 = vst.msk [vmem:[#allocation2 + $0x10] sm:$0xff] %vm655_vm3, %v1207_v36  ;;  %623 = vperm.xlu1 %1016, %v1207_v36  }
 0x1be   : > { %v595_v42 = vsub.f32 %v1204_v34, %v1210_v38  ;;  %684 = vst.msk [vmem:[#allocation2] sm:$0xff] %vm655_vm3, %v1210_v38  ;;  %v586_v43 = vpop.xlane.xlu1 %585  ;;  %613 = vperm.xlu0 %1015, %v1210_v38  }
 0x1bf   : > { %v1227_v44 = vmax.f32 %v1212_v39, %v586_v43  ;;  %v582_v45 = vpop.xlane.xlu0 %581  ;;  %v603_v20 = vmul.f32 1.442695, %v597_v40 }
 0x1c0   : > { %v588_v46 = vmax.f32 %v1219_v41, %v582_v45  ;;  %v599_v21 = vmul.f32 1.442695, %v595_v42 }
 0x1c1   : > { %v598_v47 = vsub.f32 %v1212_v39, %v1227_v44  ;;  %687 = vst.msk [vmem:[#allocation2 + $0x18] sm:$0xff] %vm655_vm3, %v1227_v44  ;;  %v594_v39 = vld [vmem:[#allocation3 + $0x18] sm:$0xff] }
 0x1c2   : > { %v596_v48 = vsub.f32 %v1219_v41, %v588_v46  ;;  %685 = vst.msk [vmem:[#allocation2 + $0x8] sm:$0xff] %vm655_vm3, %v588_v46  ;;  %618 = vperm.xlu1 %1016, %v588_v46   ;;  %v662_v41 = vld [vmem:[#allocation4 + $0x10] sm:$0xff] }
 0x1c3   : > { %v605_v23 = vmul.f32 1.442695, %v598_v47  ;;  %v663_v47 = vld [vmem:[#allocation4 + $0x18] sm:$0xff] }
 0x1c4   : > { %v601_v22 = vmul.f32 1.442695, %v596_v48 }
 0x1c5   : > { %v692_v50 = vld [vmem:[#allocation2] sm:$0xff] (!%p945_p7) }
 0x1c6   : > { %628 = vperm.xlu1 %1016, %v1227_v44   ;;  %v704_v52 = vsub.f32 (!%p945_p7), %v700_v51, %v692_v50 }
 0x1ea   : > { %668 = vadd.xlane.f32.xlu1 %v664_v53  ;;  %v1260_v53 = vld [vmem:[#allocation2 + $0x8] sm:$0xff] (!%p945_p7) }
 0x1ee   : > { %670 = vadd.xlane.f32.xlu1 %v665_v55  ;;  %v708_v55 = vmul.f32 (!%p945_p7), 1.442695, %v704_v52 }
 0x23c   : > { %v624_v56 = vpop.permute.xlu1 %623 }
 0x23d   : > { %v633_v57 = vsub.f32 %v1196_v25, %v624_v56  ;;  %v614_v58 = vpop.permute.xlu0 %613  ;;  %v593_v25 = vld [vmem:[#allocation3 + $0x10] sm:$0xff]  ;;  %v705_v56 = vsub.f32 (!%p945_p7), %v701_v54, %v1260_v53 }
 0x23e   : > { %v631_v59 = vsub.f32 %v562_v27, %v614_v58  ;;  %v702_v58 = vld [vmem:[%s1333_s3 + $0x10] sm:$0xff] (!%p945_p7) }
 0x23f   : > { %v639_v60 = vmul.f32 1.442695, %v633_v57  ;;  %v1266_v57 = vld [vmem:[#allocation2 + $0x10] sm:$0xff] (!%p945_p7) }
 0x240   : > { %v635_v61 = vmul.f32 1.442695, %v631_v59  ;;  %v710_v59 = vmul.f32 (!%p945_p7), 1.442695, %v705_v56 }
 0x241   : > { %1027 = vpow2.f32 %v639_v60  ;;  %v619_v62 = vpop.permute.xlu1 %618  ;;  %v706_v60 = vsub.f32 (!%p945_p7), %v702_v58, %v1266_v57 }
 0x242   : > { %v632_v63 = vsub.f32 %v563_v31, %v619_v62  ;;  %1029 = vpow2.f32 %v635_v61  ;;  %v1272_v61 = vld [vmem:[#allocation2 + $0x18] sm:$0xff] (!%p945_p7) }
 0x243   : > { %v703_v62 = vld [vmem:[%s1333_s3 + $0x18] sm:$0xff] (!%p945_p7) }
 0x244   : > { %v637_v0 = vmul.f32 1.442695, %v632_v63  ;;  %v712_v63 = vmul.f32 (!%p945_p7), 1.442695, %v706_v60 }
 0x245   : > { %v629_v1 = vpop.permute.xlu1 %628 }
 0x246   : > { %1031 = vpow2.f32 %v637_v0  ;;  %v634_v2 = vsub.f32 %v1199_v30, %v629_v1  ;;  %v707_v0 = vsub.f32 (!%p945_p7), %v703_v62, %v1272_v61 }
 0x248   : > { %v641_v3 = vmul.f32 1.442695, %v634_v2  ;;  %v714_v1 = vmul.f32 (!%p945_p7), 1.442695, %v707_v0 }
 0x24a   : > { %1033 = vpow2.f32 %v641_v3 }
 0x24b   : > { %v1028_v4 = vpop.eup %1027  ;;  %1035 = vpow2.f32 %v603_v20 }
 0x24c   : > { %647 = vadd.xlane.f32.xlu1 %v1028_v4  ;;  %v1030_v6 = vpop.eup %1029  ;;  %1037 = vpow2.f32 %v599_v21 }
 0x24d   : > { %1039 = vpow2.f32 %v601_v22 }
 0x24e   : > { %1041 = vpow2.f32 %v605_v23  ;;  %v741_v23 = vld [vmem:[%s1335_s5 + $0x8] sm:$0xff] (!%p945_p7) }
 0x24f   : > { %1043 = vpow2.f32 (!%p945_p7), %v708_v55 }
 0x250   : > { %v1032_v9 = vpop.eup %1031  ;;  %643 = vadd.xlane.f32.xlu1 %v1030_v6  ;;  %1045 = vpow2.f32 (!%p945_p7), %v710_v59 }
 0x251   : > { %645 = vadd.xlane.f32.xlu0 %v1032_v9  ;;  %1047 = vpow2.f32 (!%p945_p7), %v712_v63 }
 0x252   : > { %1049 = vpow2.f32 (!%p945_p7), %v714_v1 }
 0x254   : > { %v1034_v12 = vpop.eup %1033 }
 0x255   : > { %672 = vadd.xlane.f32.xlu0 %v666_v10  ;;  %649 = vadd.xlane.f32.xlu1 %v1034_v12  ;;  %v1036_v24 = vpop.eup %1035 }
 0x256   : > { %v609_v26 = vmul.f32 %v1036_v24, %v593_v25  ;;  %v1038_v27 = vpop.eup %1037  ;;  %v742_v24 = vld [vmem:[%s1335_s5 + $0x10] sm:$0xff] (!%p945_p7)  ;;  %v743_v25 = vld [vmem:[%s1335_s5 + $0x18] sm:$0xff] (!%p945_p7) }
 0x257   : > { %v1040_v30 = vpop.eup %1039  ;;  %v607_v33 = vmul.f32 %v1038_v27, %v591_v29 }
 0x258   : > { %v608_v34 = vmul.f32 %v1040_v30, %v592_v32  ;;  %v1042_v36 = vpop.eup %1041  ;;  %v749_v32 = vld [vmem:[%s1334_s4 + $0x8] sm:$0xff] (!%p945_p7) }
 0x259   : > { %674 = vadd.xlane.f32.xlu1 %v667_v13  ;;  %v610_v42 = vmul.f32 %v1042_v36, %v594_v39  ;;  %v1044_v3 = vpop.eup (!%p945_p7), %1043 }
 0x25a   : > { %v1046_v6 = vpop.eup (!%p945_p7), %1045 }
 0x25b   : > { %v1048_v10 = vpop.eup (!%p945_p7), %1047 }
 0x277   : > { %v669_v15 = vpop.xlane.xlu1 %668 }
 0x278   : > { %v676_v16 = vadd.f32 %v669_v15, %v660_v14  ;;  %v1050_v15 = vpop.eup (!%p945_p7), %1049 }
 0x27a   : > { %680 = vst.msk [vmem:[#allocation4] sm:$0xff] %vm655_vm3, %v676_v16 }
 0x27b   : > { %v671_v18 = vpop.xlane.xlu1 %670 }
 0x27c   : > { %v677_v19 = vadd.f32 %v671_v18, %v661_v17 }
 0x27e   : > { %681 = vst.msk [vmem:[#allocation4 + $0x8] sm:$0xff] %vm655_vm3, %v677_v19  ;;  %v740_v19 = vld [vmem:[%s1335_s5] sm:$0xff] (!%p945_p7) }
 0x281   : > { %v744_v27 = vld [vmem:[#allocation4] sm:$0xff] (!%p945_p7) }
 0x2d9   : > { %v648_v28 = vpop.xlane.xlu1 %647 }
 0x2da   : > { %v653_v31 = vadd.f32 %v648_v28, %v609_v26  ;;  %v748_v28 = vld [vmem:[%s1334_s4] sm:$0xff] (!%p945_p7) }
 0x2dc   : > { %658 = vst.msk [vmem:[#allocation3 + $0x10] sm:$0xff] %vm655_vm3, %v653_v31  ;;  %v745_v31 = vld [vmem:[#allocation4 + $0x8] sm:$0xff] (!%p945_p7) }
 0x2dd   : > { %v644_v35 = vpop.xlane.xlu1 %643 }
 0x2de   : > { %v651_v37 = vadd.f32 %v644_v35, %v607_v33  ;;  %v646_v38 = vpop.xlane.xlu0 %645  ;;  %v752_v35 = vsub.f32 (!%p945_p7), %v744_v27, %v748_v28 }
 0x2df   : > { %v652_v40 = vadd.f32 %v646_v38, %v608_v34 }
 0x2e0   : > { %656 = vst.msk [vmem:[#allocation3] sm:$0xff] %vm655_vm3, %v651_v37  ;;  %v750_v37 = vld [vmem:[%s1334_s4 + $0x10] sm:$0xff] (!%p945_p7) }
 0x2e1   : > { %657 = vst.msk [vmem:[#allocation3 + $0x8] sm:$0xff] %vm655_vm3, %v652_v40 }
 0x2e2   : > { %v673_v43 = vpop.xlane.xlu0 %672  ;;  %v650_v44 = vpop.xlane.xlu1 %649 }
 0x2e3   : > { %v678_v45 = vadd.f32 %v673_v43, %v662_v41  ;;  %v654_v46 = vadd.f32 %v650_v44, %v610_v42  ;;  %691 = sbr.rel (%p945_p7) target bundleno = 779 (0x30b), region = 52  ;;  %v698_v7 = vld [vmem:[#allocation3 + $0x10] sm:$0xff] (!%p945_p7)  ;;  %v753_v42 = vsub.f32 (!%p945_p7), %v745_v31, %v749_v32 }
 0x2e4   : > { %v718_v14 = vsub.f32 (!%p945_p7), %v698_v7, %v1048_v10 }
 0x2e5   : > { %682 = vst.msk [vmem:[#allocation4 + $0x10] sm:$0xff] %vm655_vm3, %v678_v45  ;;  %659 = vst.msk [vmem:[#allocation3 + $0x18] sm:$0xff] %vm655_vm3, %v654_v46  ;;  %v751_v45 = vld [vmem:[%s1334_s4 + $0x18] sm:$0xff] (!%p945_p7) }
 0x2e6   : > { %v675_v48 = vpop.xlane.xlu1 %674  ;;  %v722_v17 = vmax.f32 (!%p945_p7), %v718_v14, 0.0 }
 0x2e7   : > { %v679_v49 = vadd.f32 %v675_v48, %v663_v47  ;;  %v696_v2 = vld [vmem:[#allocation3] sm:$0xff] (!%p945_p7) }
 0x2e8   : > { %v697_v4 = vld [vmem:[#allocation3 + $0x8] sm:$0xff] (!%p945_p7)  ;;  %v716_v5 = vsub.f32 (!%p945_p7), %v696_v2, %v1044_v3  ;;  %v726_v20 = vadd.f32 (!%p945_p7), 1e-12, %v722_v17 }
 0x2e9   : > { %683 = vst.msk [vmem:[#allocation4 + $0x18] sm:$0xff] %vm655_vm3, %v679_v49  ;;  %v717_v9 = vsub.f32 (!%p945_p7), %v697_v4, %v1046_v6 }
 0x2ea   : > { %v720_v8 = vmax.f32 %v716_v5, 0.0 }
 0x2eb   : > { %v721_v13 = vmax.f32 %v717_v9, 0.0 }
 0x2ec   : > { %v699_v11 = vld [vmem:[#allocation3 + $0x18] sm:$0xff]  ;;  %v724_v12 = vadd.f32 1e-12, %v720_v8  ;;  %v746_v36 = vld [vmem:[#allocation4 + $0x10] sm:$0xff] }
 0x2ed   : > { %v725_v16 = vadd.f32 1e-12, %v721_v13  ;;  %v719_v18 = vsub.f32 %v699_v11, %v1050_v15  ;;  %v754_v47 = vsub.f32 %v746_v36, %v750_v37 }
 0x2ee   : > { %1051 = vlog2.f32 %v724_v12 }
 0x2ef   : > { %1053 = vlog2.f32 %v725_v16  ;;  %v723_v21 = vmax.f32 %v719_v18, 0.0 }
 0x2f0   : > { %1055 = vlog2.f32 %v726_v20  ;;  %v747_v44 = vld [vmem:[#allocation4 + $0x18] sm:$0xff] }
 0x2f1   : > { %v727_v22 = vadd.f32 1e-12, %v723_v21  ;;  %1057 = vrcp.f32 %v740_v19  ;;  %v755_v54 = vsub.f32 %v747_v44, %v751_v45 }
 0x2f3   : > { %1059 = vlog2.f32 %v727_v22 }
 0x2f4   : > { %1061 = vrcp.f32 %v741_v23 }
 0x2f5   : > { %1063 = vrcp.f32 %v742_v24 }
 0x2f6   : > { %1065 = vrcp.f32 %v743_v25 }
 0x2f8   : > { %v1052_v26 = vpop.eup %1051 }
 0x2f9   : > { %v729_v29 = vmul.f32 0.6931472, %v1052_v26  ;;  %v1054_v30 = vpop.eup %1053 }
 0x2fa   : > { %v731_v34 = vmul.f32 0.6931472, %v1054_v30  ;;  %v1056_v38 = vpop.eup %1055 }
 0x2fb   : > { %v736_v33 = vadd.f32 %v729_v29, %v692_v50  ;;  %v1058_v39 = vpop.eup %1057  ;;  %v733_v43 = vmul.f32 0.6931472, %v1056_v38 }
 0x2fc   : > { %v737_v41 = vadd.f32 %v731_v34, %v1260_v53 }
 0x2fd   : > { %v756_v40 = vmul.f32 %v740_v19, %v736_v33  ;;  %v1060_v46 = vpop.eup %1059  ;;  %v738_v50 = vadd.f32 %v733_v43, %v1266_v57 }
 0x2fe   : > { %v757_v49 = vmul.f32 %v741_v23, %v737_v41  ;;  %v735_v51 = vmul.f32 0.6931472, %v1060_v46  ;;  %v1062_v52 = vpop.eup %1061 }
 0x2ff   : > { %v760_v48 = vsub.f32 %v752_v35, %v756_v40  ;;  %v758_v58 = vmul.f32 %v742_v24, %v738_v50  ;;  %v1064_v59 = vpop.eup %1063 }
 0x300   : > { %v761_v56 = vsub.f32 %v753_v42, %v757_v49  ;;  %v739_v53 = vadd.f32 %v735_v51, %v1272_v61  ;;  %v1066_v1 = vpop.eup %1065 }
 0x301   : > { %v765_v55 = vmul.f32 %v1058_v39, %v760_v48  ;;  %v762_v63 = vsub.f32 %v754_v47, %v758_v58 }
 0x302   : > { %v767_v62 = vmul.f32 %v1062_v52, %v761_v56  ;;  %v759_v0 = vmul.f32 %v743_v25, %v739_v53 }
 0x303   : > { %v772_v60 = vmul.f32 -1.0, %v765_v55  ;;  %v769_v2 = vmul.f32 %v1064_v59, %v762_v63 }
 0x304   : > { %v773_v57 = vmul.f32 -1.0, %v767_v62  ;;  %v763_v3 = vsub.f32 %v755_v54, %v759_v0 }
 0x305   : > { %776 = vst.msk [vmem:[%s1336_s6] sm:$0xff] %vm655_vm3, %v772_v60  ;;  %v774_v61 = vmul.f32 -1.0, %v769_v2 }
 0x306   : > { %777 = vst.msk [vmem:[%s1336_s6 + $0x8] sm:$0xff] %vm655_vm3, %v773_v57  ;;  %v771_v4 = vmul.f32 %v1066_v1, %v763_v3 }
 0x307   : > { %778 = vst.msk [vmem:[%s1336_s6 + $0x10] sm:$0xff] %vm655_vm3, %v774_v61 }
 0x308   : > { %v775_v5 = vmul.f32 -1.0, %v771_v4 }
 0x30a   : > { %779 = vst.msk [vmem:[%s1336_s6 + $0x18] sm:$0xff] %vm655_vm3, %v775_v5 }
 0x30b PF: > { %s16_s23 = sadd.s32 1, %s1089_s23   ;;  %s1337_s21 = smov %s1085_s22 }
 0x30c   : > { %p13_p8 = scmp.ge.s32.totalorder %s16_s23, 5   ;;  %s1338_s22 = smov %s1340_s24 }
 0x30e   :  { %15 = sbr.rel (!%p13_p8) target bundleno = 2 (0x2), region = 97 }

</bundles_post_ra>
